<compile_context>
chip_gen: v7x
topology: tpu7x:2x2x1
jax: 0.10.0
libtpu: 0.0.40
codegen_flags: <defaults>
</compile_context>

<pallas_src>
import functools

import jax
import jax.numpy as jnp
from jax.experimental import pallas as pl
from jax.experimental.pallas import tpu as pltpu


def _round_up(n: int, m: int) -> int:
    return ((n + m - 1) // m) * m


def _actor_kernel(x_ref, w1_ref, b1_ref, w2_ref, b2_ref, w3_ref, b3_ref,
                  o_ref, *, max_action):
    # Layer 1: cast f32 x to the (bf16) weight dtype only at the MXU input;
    # accumulate in f32, bias-add + relu in f32.
    h1 = jnp.dot(x_ref[...].astype(w1_ref.dtype), w1_ref[...],
                 preferred_element_type=jnp.float32)
    h1 = jnp.maximum(h1 + b1_ref[...], 0.0)

    # Layer 2.
    h2 = jnp.dot(h1.astype(w2_ref.dtype), w2_ref[...],
                 preferred_element_type=jnp.float32)
    h2 = jnp.maximum(h2 + b2_ref[...], 0.0)

    # Layer 3: f32 bias add + tanh + scale; lane-dense (128-multiple) store.
    h3 = jnp.dot(h2.astype(w3_ref.dtype), w3_ref[...],
                 preferred_element_type=jnp.float32)
    o_ref[...] = (max_action * jnp.tanh(h3 + b3_ref[...])).astype(o_ref.dtype)


def prepare_actor_params(params, *, compute_dtype=jnp.bfloat16):
    """One-time prep: zero-pad all feature dims to lane multiples of 128 and
    cast weights to the MXU compute dtype.  Zero-padded K rows/cols and
    zero-padded biases contribute nothing (relu(0)=0), so results are exact up
    to the final slice.  Call once per parameter update and reuse."""
    w1, w2, w3 = params["w1"], params["w2"], params["w3"]
    b1, b2, b3 = params["b1"], params["b2"], params["b3"]
    S, H1 = w1.shape
    H2, A = w2.shape[1], w3.shape[1]
    Sp, H1p, H2p, Ap = (_round_up(d, 128) for d in (S, H1, H2, A))

    def pad_w(w, rows, cols):
        return (jnp.zeros((rows, cols), compute_dtype)
                .at[:w.shape[0], :w.shape[1]].set(w.astype(compute_dtype)))

    def pad_b(b, cols):
        b = jnp.asarray(b, jnp.float32).reshape(1, -1)
        return jnp.zeros((1, cols), jnp.float32).at[:, :b.shape[1]].set(b)

    return {
        "w1": pad_w(w1, Sp, H1p), "b1": pad_b(b1, H1p),
        "w2": pad_w(w2, H1p, H2p), "b2": pad_b(b2, H2p),
        "w3": pad_w(w3, H2p, Ap), "b3": pad_b(b3, Ap),
        "action_dim": A,  # true (unpadded) output width, for the final slice
    }


def actor_forward(x, prepared, max_action):
    """x: (B, state_dim) float32.  prepared: output of prepare_actor_params."""
    w1p, b1p = prepared["w1"], prepared["b1"]
    w2p, b2p = prepared["w2"], prepared["b2"]
    w3p, b3p = prepared["w3"], prepared["b3"]
    A = prepared["action_dim"]

    B, S = x.shape
    Sp, H1p = w1p.shape
    H2p = w2p.shape[1]
    Ap = w3p.shape[1]

    # Feature-pad x only when state_dim is not lane-aligned (exact: padded
    # columns multiply zero-padded w1 rows).  Batch stays ragged; dtype stays
    # f32 (cast happens inside the kernel at the first dot).
    if S != Sp:
        x = jnp.zeros((B, Sp), x.dtype).at[:, :S].set(x)

    kernel = functools.partial(_actor_kernel, max_action=float(max_action))
    args = (x, w1p, b1p, w2p, b2p, w3p, b3p)
    out_shape = jax.ShapeDtypeStruct((B, Ap), jnp.float32)

    if B < 512:
        # Single-step path: no grid -> whole arrays become the blocks, no
        # pipeline prologue/epilogue overhead for the small-batch case.
        out_padded = pl.pallas_call(kernel, out_shape=out_shape)(*args)
    else:
        # Batch-tiled path: even number of >=16-row tiles (<=~1024 rows each)
        # so the "parallel" axis feeds both TensorCores on v7x; weights/biases
        # use constant index_maps and stay resident in VMEM across steps.
        n_steps = max(2, _round_up(pl.cdiv(B, 1024), 2))
        TB = _round_up(pl.cdiv(B, n_steps), 16)
        grid = (pl.cdiv(B, TB),)
        out_padded = pl.pallas_call(
            kernel,
            out_shape=out_shape,
            grid=grid,
            in_specs=[
                pl.BlockSpec((TB, Sp), lambda i: (i, 0)),     # x: batch-tiled
                pl.BlockSpec((Sp, H1p), lambda i: (0, 0)),    # weights/biases:
                pl.BlockSpec((1, H1p), lambda i: (0, 0)),     #   VMEM-resident
                pl.BlockSpec((H1p, H2p), lambda i: (0, 0)),
                pl.BlockSpec((1, H2p), lambda i: (0, 0)),
                pl.BlockSpec((H2p, Ap), lambda i: (0, 0)),
                pl.BlockSpec((1, Ap), lambda i: (0, 0)),
            ],
            out_specs=pl.BlockSpec((TB, Ap), lambda i: (i, 0)),
            compiler_params=pltpu.CompilerParams(
                dimension_semantics=("parallel",),
            ),
        )(*args)

    return out_padded[:, :A]


def init_actor_params(key, state_dim, action_dim):
    """Deterministic init mimicking PyTorch nn.Linear default:
    U(-1/sqrt(fan_in), 1/sqrt(fan_in)) for both weight and bias.
    Weights stored as (in_features, out_features). Biases stored as (1, out)."""
    dims = [(state_dim, 400), (400, 300), (300, action_dim)]
    params = {}
    for i, (fan_in, fan_out) in enumerate(dims, start=1):
        key, kw, kb = jax.random.split(key, 3)
        bound = 1.0 / jnp.sqrt(jnp.float32(fan_in))
        params[f"w{i}"] = jax.random.uniform(
            kw, (fan_in, fan_out), jnp.float32, minval=-bound, maxval=bound)
        params[f"b{i}"] = jax.random.uniform(
            kb, (1, fan_out), jnp.float32, minval=-bound, maxval=bound)
    return params


def actor_forward_ref(x, params, max_action):
    """Pure-JAX f32 reference for correctness checking."""
    h = jnp.maximum(x @ params["w1"] + params["b1"], 0.0)
    h = jnp.maximum(h @ params["w2"] + params["b2"], 0.0)
    return max_action * jnp.tanh(h @ params["w3"] + params["b3"])


if __name__ == "__main__":
    state_dim = 32
    action_dim = 8
    max_action = 1.0

    key = jax.random.PRNGKey(0)
    key, kx1, kx2 = jax.random.split(key, 3)
    params = init_actor_params(key, state_dim, action_dim)
    prepared = prepare_actor_params(params)   # hoisted: once per param update

    # Small-batch (gridless) path — matches the module's typical act() call.
    batch = 2
    x_small = jax.random.normal(kx1, (batch, state_dim), jnp.float32)
    out_small = jax.block_until_ready(actor_forward(x_small, prepared, max_action))
    ref_small = actor_forward_ref(x_small, params, max_action)
    assert out_small.shape == (batch, action_dim)
    # bf16 weight/activation cast at the MXU inputs -> loosened tolerance vs f32 ref.
    assert jnp.allclose(out_small, ref_small, atol=2e-2, rtol=2e-2), "small-batch mismatch"

    # Larger batch exercises the batch-tiled (2-step, megacore-parallel) path.
    big = 768
    x_big = jax.random.normal(kx2, (big, state_dim), jnp.float32)
    out_big = jax.block_until_ready(actor_forward(x_big, prepared, max_action))
    ref_big = actor_forward_ref(x_big, params, max_action)
    assert out_big.shape == (big, action_dim)
    assert jnp.allclose(out_big, ref_big, atol=2e-2, rtol=2e-2), "batched mismatch"

    print("KERNEL_OK")
</pallas_src>

<mosaic_0001>
module attributes {stable_mosaic.version = 11 : i64} {
  func.func @_actor_kernel(%arg0: memref<2x128xf32, #tpu.memory_space<vmem>>, %arg1: memref<128x512xbf16, #tpu.memory_space<vmem>>, %arg2: memref<1x512xf32, #tpu.memory_space<vmem>>, %arg3: memref<512x384xbf16, #tpu.memory_space<vmem>>, %arg4: memref<1x384xf32, #tpu.memory_space<vmem>>, %arg5: memref<384x128xbf16, #tpu.memory_space<vmem>>, %arg6: memref<1x128xf32, #tpu.memory_space<vmem>>, %arg7: memref<2x128xf32, #tpu.memory_space<vmem>>) attributes {dimension_semantics = [], scalar_prefetch = 0 : i64, scratch_operands = 0 : i64, tpu.core_type = #tpu.core_type<tc>} {
    %c0 = arith.constant 0 : index
    %c0_0 = arith.constant 0 : index
    %0 = vector.load %arg0[%c0, %c0_0] : memref<2x128xf32, #tpu.memory_space<vmem>>, vector<2x128xf32>
    %1 = arith.truncf %0 : vector<2x128xf32> to vector<2x128xbf16>
    %c0_1 = arith.constant 0 : index
    %c0_2 = arith.constant 0 : index
    %2 = vector.load %arg1[%c0_1, %c0_2] : memref<128x512xbf16, #tpu.memory_space<vmem>>, vector<128x512xbf16>
    %cst = arith.constant dense<0.000000e+00> : vector<2x512xf32>
    %3 = tpu.matmul %1, %2, %cst {dimension_numbers = #tpu.dot_dimension_numbers<[1], [0], [0], [1], [0, 0, 1, 1], [], []>} : vector<2x128xbf16>, vector<128x512xbf16>, vector<2x512xf32> -> vector<2x512xf32>
    %c0_3 = arith.constant 0 : index
    %c0_4 = arith.constant 0 : index
    %4 = vector.load %arg2[%c0_3, %c0_4] : memref<1x512xf32, #tpu.memory_space<vmem>>, vector<1x512xf32>
    %5 = vector.broadcast %4 : vector<1x512xf32> to vector<2x512xf32>
    %6 = arith.addf %3, %5 : vector<2x512xf32>
    %cst_5 = arith.constant 0.000000e+00 : f32
    %7 = vector.broadcast %cst_5 : f32 to vector<2x512xf32>
    %8 = arith.maximumf %6, %7 : vector<2x512xf32>
    %9 = arith.truncf %8 : vector<2x512xf32> to vector<2x512xbf16>
    %c0_6 = arith.constant 0 : index
    %c0_7 = arith.constant 0 : index
    %10 = vector.load %arg3[%c0_6, %c0_7] : memref<512x384xbf16, #tpu.memory_space<vmem>>, vector<512x384xbf16>
    %cst_8 = arith.constant dense<0.000000e+00> : vector<2x384xf32>
    %11 = tpu.matmul %9, %10, %cst_8 {dimension_numbers = #tpu.dot_dimension_numbers<[1], [0], [0], [1], [0, 0, 1, 1], [], []>} : vector<2x512xbf16>, vector<512x384xbf16>, vector<2x384xf32> -> vector<2x384xf32>
    %c0_9 = arith.constant 0 : index
    %c0_10 = arith.constant 0 : index
    %12 = vector.load %arg4[%c0_9, %c0_10] : memref<1x384xf32, #tpu.memory_space<vmem>>, vector<1x384xf32>
    %13 = vector.broadcast %12 : vector<1x384xf32> to vector<2x384xf32>
    %14 = arith.addf %11, %13 : vector<2x384xf32>
    %cst_11 = arith.constant 0.000000e+00 : f32
    %15 = vector.broadcast %cst_11 : f32 to vector<2x384xf32>
    %16 = arith.maximumf %14, %15 : vector<2x384xf32>
    %17 = arith.truncf %16 : vector<2x384xf32> to vector<2x384xbf16>
    %c0_12 = arith.constant 0 : index
    %c0_13 = arith.constant 0 : index
    %18 = vector.load %arg5[%c0_12, %c0_13] : memref<384x128xbf16, #tpu.memory_space<vmem>>, vector<384x128xbf16>
    %cst_14 = arith.constant dense<0.000000e+00> : vector<2x128xf32>
    %19 = tpu.matmul %17, %18, %cst_14 {dimension_numbers = #tpu.dot_dimension_numbers<[1], [0], [0], [1], [0, 0, 1, 1], [], []>} : vector<2x384xbf16>, vector<384x128xbf16>, vector<2x128xf32> -> vector<2x128xf32>
    %c0_15 = arith.constant 0 : index
    %c0_16 = arith.constant 0 : index
    %20 = vector.load %arg6[%c0_15, %c0_16] : memref<1x128xf32, #tpu.memory_space<vmem>>, vector<1x128xf32>
    %21 = vector.broadcast %20 : vector<1x128xf32> to vector<2x128xf32>
    %22 = arith.addf %19, %21 : vector<2x128xf32>
    %23 = math.tanh %22 : vector<2x128xf32>
    %cst_17 = arith.constant 1.000000e+00 : f32
    %24 = vector.broadcast %cst_17 : f32 to vector<2x128xf32>
    %25 = arith.mulf %24, %23 : vector<2x128xf32>
    %c0_18 = arith.constant 0 : index
    %c0_19 = arith.constant 0 : index
    %26 = vector.load %arg7[%c0_18, %c0_19] : memref<2x128xf32, #tpu.memory_space<vmem>>, vector<2x128xf32>
    tpu.vector_store %arg7[%c0_18, %c0_19], %25 {strides = array<i32>} : memref<2x128xf32, #tpu.memory_space<vmem>>, vector<2x128xf32>,
    return
  }
}

</mosaic_0001>

<bundles_post_ra>
// kernel: tpu_custom_call.1
= control target key start
LH: loop header
LB: loop body
LE: loop exit
PB: predicated region body
PF: predicated region fallthrough
CT: control target
= control target key end

     0   :  { %12 = vsyncpa [#allocation3], 0  ;;  %s2245_s0 = inlined_call_operand.hbm [shape: f32[2,128], index: 0, kind: input, shape index: {}]   ;;  %s2246_s1 = inlined_call_operand.hbm [shape: bf16[128,512], index: 1, kind: input, shape index: {}]   ;;  %s2247_s2 = inlined_call_operand.vmem [shape: f32[1,512], index: 2, kind: input, shape index: {}]   ;;  %s2248_s3 = inlined_call_operand.hbm [shape: bf16[512,384], index: 3, kind: input, shape index: {}]   ;;  %s2249_s4 = inlined_call_operand.vmem [shape: f32[1,384], index: 4, kind: input, shape index: {}]   ;;  %s2250_s5 = inlined_call_operand.hbm [shape: bf16[384,128], index: 5, kind: input, shape index: {}]   ;;  %s2251_s6 = inlined_call_operand.vmem [shape: f32[1,128], index: 6, kind: input, shape index: {}]   ;;  %s2252_s7 = inlined_call_operand.hbm [shape: f32[2,128], index: 7, kind: output, shape index: {}]  }
   0x1   :  { %13 = vsyncpa [#allocation6], 0 }
   0x2   :  { %14 = vsyncpa [#allocation9], 0 }
   0x3   :  { %15 = vsyncpa [#allocation4], 0  ;;  %s2098_s24 = smov [#allocation5]   ;;  %s1980_s28 = scalar_lea.hbm %s2246_s1, 4096 }
   0x4   :  { %s31_s25 = sshll.u32 %s2098_s24, 4  ;;  %p1981_p0 = scmp.ne.s32.totalorder %s2246_s1, %s1980_s28  ;;  %s32_s25 = int_to_ptr.vmem [resolvable:$true] %s31_s25 }
   0x5   :  { %p1984_p1 = scmp.lt.u32.totalorder %s1980_s28, %s2246_s1 }
   0x7   :  { %p1986_p2 = pnand %p1984_p1, %p1981_p0 }
   0x9   :  { %1989 = shalt.err (!%p1986_p2)
}
   0xa   :  { %s1990_s10 = scalar_lea.vmem %s32_s25, 4096  ;;  %p1995_p4 = scmp.lt.s32.totalorder %s32_s25, %s32_s25 }
   0xb   :  { %p1991_p3 = scmp.ne.s32.totalorder %s32_s25, %s1990_s10  ;;  %p1996_p5 = scmp.lt.s32.totalorder %s1990_s10, %s1990_s10 }
   0xd   :  { %p1997_p6 = por %p1996_p5, %p1995_p4 }
   0xf   :  { %p1998_p7 = pnand %p1997_p6, %p1991_p3 }
  0x11   :  { %2001 = shalt.err (!%p1998_p7)
}
  0x12   :  { %s2099_s11 = smov 256   ;;  %s2100_s12 = smov 16  }
  0x13   :  { %37 = dma.hbm_to_vmem [thread:$0]  %s2246_s1, 4096, %s32_s25, [#allocation6], %s2099_s11, %s2099_s11, %s2100_s12  }
  0x14   :  { %s2101_s15 = smov [#allocation2]   ;;  %s2102_s17 = smov [#allocation7]  }
  0x15   :  { %s22_s16 = sshll.u32 %s2101_s15, 4  ;;  %s45_s18 = sshll.u32 %s2102_s17, 4  ;;  %s23_s16 = int_to_ptr.vmem [resolvable:$true] %s22_s16  ;;  %s46_s18 = int_to_ptr.vmem [resolvable:$true] %s45_s18 }
  0x16   :  { %s2002_s21 = scalar_lea.hbm %s2245_s0, 32 }
  0x17   :  { %p2003_p8 = scmp.ne.s32.totalorder %s2245_s0, %s2002_s21  ;;  %p2006_p9 = scmp.lt.u32.totalorder %s2002_s21, %s2245_s0 }
  0x19   :  { %p2008_p10 = pnand %p2006_p9, %p2003_p8 }
  0x1b   :  { %2011 = shalt.err (!%p2008_p10)
}
  0x1c   :  { %s2012_s1 = scalar_lea.vmem %s23_s16, 32  ;;  %p2017_p12 = scmp.lt.s32.totalorder %s23_s16, %s23_s16 }
  0x1d   :  { %p2013_p11 = scmp.ne.s32.totalorder %s23_s16, %s2012_s1  ;;  %p2018_p13 = scmp.lt.s32.totalorder %s2012_s1, %s2012_s1 }
  0x1f   :  { %p2019_p0 = por %p2018_p13, %p2017_p12 }
  0x21   :  { %p2020_p1 = pnand %p2019_p0, %p2013_p11 }
  0x23   :  { %2023 = shalt.err (!%p2020_p1)
}
  0x24   :  { %25 = dma.hbm_to_vmem [thread:$0]  %s2245_s0, 32, %s23_s16, [#allocation3]  }
  0x25   :  { %s2024_s30 = scalar_lea.hbm %s2248_s3, 12288 }
  0x26   :  { %p2025_p2 = scmp.ne.s32.totalorder %s2248_s3, %s2024_s30  ;;  %p2028_p3 = scmp.lt.u32.totalorder %s2024_s30, %s2248_s3 }
  0x28   :  { %p2030_p4 = pnand %p2028_p3, %p2025_p2 }
  0x2a   :  { %2033 = shalt.err (!%p2030_p4)
}
  0x2b   :  { %s2034_s12 = scalar_lea.vmem %s46_s18, 12288  ;;  %p2039_p6 = scmp.lt.s32.totalorder %s46_s18, %s46_s18 }
  0x2c   :  { %p2035_p5 = scmp.ne.s32.totalorder %s46_s18, %s2034_s12  ;;  %p2040_p7 = scmp.lt.s32.totalorder %s2034_s12, %s2034_s12 }
  0x2e   :  { %p2041_p8 = por %p2040_p7, %p2039_p6 }
  0x30   :  { %p2042_p9 = pnand %p2041_p8, %p2035_p5 }
  0x32   :  { %2045 = shalt.err (!%p2042_p9)
}
  0x33   :  { %s2103_s0 = smov 192   ;;  %s2104_s13 = smov 12  }
  0x34   :  { %51 = dma.hbm_to_vmem [thread:$0]  %s2248_s3, 12288, %s46_s18, [#allocation6], %s2103_s0, %s2103_s0, %s2104_s13  }
  0x35   :  { %s2105_s16 = smov [#allocation8]   ;;  %s2046_s21 = scalar_lea.hbm %s2250_s5, 3072 }
  0x36   :  { %s59_s17 = sshll.u32 %s2105_s16, 4  ;;  %p2047_p10 = scmp.ne.s32.totalorder %s2250_s5, %s2046_s21  ;;  %s60_s17 = int_to_ptr.vmem [resolvable:$true] %s59_s17 }
  0x37   :  { %p2050_p11 = scmp.lt.u32.totalorder %s2046_s21, %s2250_s5 }
  0x39   :  { %p2052_p12 = pnand %p2050_p11, %p2047_p10 }
  0x3b   :  { %2055 = shalt.err (!%p2052_p12)
}
  0x3c   :  { %s2056_s1 = scalar_lea.vmem %s60_s17, 3072  ;;  %p2061_p0 = scmp.lt.s32.totalorder %s60_s17, %s60_s17 }
  0x3d   :  { %p2057_p13 = scmp.ne.s32.totalorder %s60_s17, %s2056_s1  ;;  %p2062_p1 = scmp.lt.s32.totalorder %s2056_s1, %s2056_s1 }
  0x3f   :  { %p2063_p2 = por %p2062_p1, %p2061_p0 }
  0x41   :  { %p2064_p3 = pnand %p2063_p2, %p2057_p13 }
  0x43   :  { %2067 = shalt.err (!%p2064_p3)
}
  0x44   :  { %s2106_s3 = smov 64   ;;  %s2107_s18 = smov 4  }
  0x45   :  { %65 = dma.hbm_to_vmem [thread:$0]  %s2250_s5, 3072, %s60_s17, [#allocation9], %s2106_s3, %s2106_s3, %s2107_s18  }
  0x46   :  { %2090 = dma.done.wait [#allocation3], 32  }
  0x47   :  { %2091 = vsyncadd [#allocation3], 4294967264 }
  0x48   :  { %2092 = dma.done.wait [#allocation6], 16384  }
  0x49   :  { %2093 = vsyncadd [#allocation6], 4294950912 }
  0x4a   :  { %2094 = dma.done.wait [#allocation9], 3072  }
  0x4b   :  { %2095 = vsyncadd [#allocation9], 4294964224  ;;  %v2108_v0 = vmov 0   ;;  %v1778_v1 = vld [vmem:[#allocation5 + $0x4] ss:$16 sps:$4 sm:$0xff]   ;;  %vm2110_vm0 = vmmov 0  }
  0x4c   :  { %329 = vmatprep.mubr.bf16.mxu0 %v2108_v0  ;;  %370 = vmatprep.mubr.bf16.mxu1 %v2108_v0  ;;  %v1780_v2 = vld [vmem:[#allocation5] ss:$16 sps:$4 sm:$0xff]   ;;  %v1781_v3 = vld [vmem:[#allocation5 + $0x24] ss:$16 sps:$4 sm:$0xff]   ;;  %v1802_v10 = vld [vmem:[#allocation5 + $0xc] ss:$16 sps:$4 sm:$0xff]  }
  0x4d   :  { %297 = vmatprep.subr.bf16.mxu0 %v1778_v1  ;;  %v1783_v4 = vld [vmem:[#allocation5 + $0x20] ss:$16 sps:$4 sm:$0xff]   ;;  %v1784_v5 = vld [vmem:[#allocation5 + $0x44] ss:$16 sps:$4 sm:$0xff]   ;;  %v1804_v11 = vld [vmem:[#allocation5 + $0x8] ss:$16 sps:$4 sm:$0xff]   ;;  %338 = vmatprep.subr.bf16.mxu1 %v1802_v10 }
  0x4e   :  { %298 = vmatpush1.bf16.msra.mxu0 %v1780_v2  ;;  %v1786_v6 = vld [vmem:[#allocation5 + $0x40] ss:$16 sps:$4 sm:$0xff]   ;;  %v1787_v7 = vld [vmem:[#allocation5 + $0x64] ss:$16 sps:$4 sm:$0xff]   ;;  %v1805_v12 = vld [vmem:[#allocation5 + $0x2c] ss:$16 sps:$4 sm:$0xff]   ;;  %339 = vmatpush1.bf16.msra.mxu1 %v1804_v11 }
  0x4f   :  { %299 = vmatprep.subr.bf16.mxu0 %v1781_v3  ;;  %v1789_v8 = vld [vmem:[#allocation5 + $0x60] ss:$16 sps:$4 sm:$0xff]   ;;  %v1790_v9 = vld [vmem:[#allocation5 + $0x84] ss:$16 sps:$4 sm:$0xff]   ;;  %v1807_v14 = vld [vmem:[#allocation5 + $0x28] ss:$16 sps:$4 sm:$0xff]   ;;  %340 = vmatprep.subr.bf16.mxu1 %v1805_v12 }
  0x50   :  { %v1792_v13 = vld [vmem:[#allocation5 + $0x80] ss:$16 sps:$4 sm:$0xff]   ;;  %v1808_v15 = vld [vmem:[#allocation5 + $0x4c] ss:$16 sps:$4 sm:$0xff]   ;;  %v1793_v16 = vld [vmem:[#allocation5 + $0xa4] ss:$16 sps:$4 sm:$0xff]  }
  0x51   :  { %v1795_v17 = vld [vmem:[#allocation5 + $0xa0] ss:$16 sps:$4 sm:$0xff]   ;;  %v1810_v18 = vld [vmem:[#allocation5 + $0x48] ss:$16 sps:$4 sm:$0xff]   ;;  %v1811_v19 = vld [vmem:[#allocation5 + $0x6c] ss:$16 sps:$4 sm:$0xff]  }
  0x52   :  { %300 = vmatpush1.bf16.msra.mxu0 %v1783_v4  ;;  %341 = vmatpush1.bf16.msra.mxu1 %v1807_v14  ;;  %v1796_v20 = vld [vmem:[#allocation5 + $0xc4] ss:$16 sps:$4 sm:$0xff]   ;;  %v1798_v21 = vld [vmem:[#allocation5 + $0xc0] ss:$16 sps:$4 sm:$0xff]   ;;  %v1813_v22 = vld [vmem:[#allocation5 + $0x68] ss:$16 sps:$4 sm:$0xff]  }
  0x53   :  { %301 = vmatprep.subr.bf16.mxu0 %v1784_v5  ;;  %342 = vmatprep.subr.bf16.mxu1 %v1808_v15  ;;  %v1814_v23 = vld [vmem:[#allocation5 + $0x8c] ss:$16 sps:$4 sm:$0xff]   ;;  %v1799_v24 = vld [vmem:[#allocation5 + $0xe4] ss:$16 sps:$4 sm:$0xff]   ;;  %v1801_v25 = vld [vmem:[#allocation5 + $0xe0] ss:$16 sps:$4 sm:$0xff]  }
  0x54   :  { %v81_v26 = vld [vmem:[#allocation2] sm:$0x3]  ;;  %v1816_v27 = vld [vmem:[#allocation5 + $0x88] ss:$16 sps:$4 sm:$0xff]   ;;  %v1828_v29 = vld [vmem:[#allocation7 + $0x4] ss:$12 sps:$4 sm:$0xff]  }
  0x55   :  { %v1817_v28 = vld [vmem:[#allocation5 + $0xac] ss:$16 sps:$4 sm:$0xff]   ;;  %v82_v30 = vpack.c.bf16 %v81_v26, %v81_v26  ;;  %v1819_v31 = vld [vmem:[#allocation5 + $0xa8] ss:$16 sps:$4 sm:$0xff]   ;;  %v1834_v38 = vld [vmem:[#allocation7 + $0x34] ss:$12 sps:$4 sm:$0xff]  }
  0x56   :  { %302 = vmatpush1.bf16.msra.mxu0 %v1786_v6  ;;  %343 = vmatpush1.bf16.msra.mxu1 %v1810_v18  ;;  %v1820_v32 = vld [vmem:[#allocation5 + $0xcc] ss:$16 sps:$4 sm:$0xff]   ;;  %v1822_v35 = vld [vmem:[#allocation5 + $0xc8] ss:$16 sps:$4 sm:$0xff]   ;;  %v1840_v46 = vld [vmem:[#allocation7 + $0x64] ss:$12 sps:$4 sm:$0xff]  }
  0x57   :  { %303 = vmatprep.subr.bf16.mxu0 %v1787_v7  ;;  %344 = vmatprep.subr.bf16.mxu1 %v1811_v19  ;;  %v1826_v33 = vld [vmem:[#allocation7] ss:$12 sps:$4 sm:$0xff]   ;;  %v1831_v34 = vld [vmem:[#allocation7 + $0x1c] ss:$12 sps:$4 sm:$0xff]   ;;  %v1829_v37 = vld [vmem:[#allocation7 + $0x18] ss:$12 sps:$4 sm:$0xff]  }
  0x58   :  { %v1823_v36 = vld [vmem:[#allocation5 + $0xec] ss:$16 sps:$4 sm:$0xff]   ;;  %v1825_v39 = vld [vmem:[#allocation5 + $0xe8] ss:$16 sps:$4 sm:$0xff]   ;;  %v1846_v54 = vld [vmem:[#allocation7 + $0x94] ss:$12 sps:$4 sm:$0xff]  }
  0x59   :  { %v1832_v40 = vld [vmem:[#allocation7 + $0x30] ss:$12 sps:$4 sm:$0xff]   ;;  %v1853_v41 = vld [vmem:[#allocation7 + $0xc8] ss:$12 sps:$4 sm:$0xff]   ;;  %v1837_v42 = vld [vmem:[#allocation7 + $0x4c] ss:$12 sps:$4 sm:$0xff]  }
  0x5a   :  { %304 = vmatpush1.bf16.msra.mxu0 %v1789_v8  ;;  %345 = vmatpush1.bf16.msra.mxu1 %v1813_v22  ;;  %v1854_v43 = vld [vmem:[#allocation7 + $0x8] ss:$12 sps:$4 sm:$0xff]   ;;  %v1858_v45 = vld [vmem:[#allocation7 + $0xe0] ss:$12 sps:$4 sm:$0xff]   ;;  %v1863_v49 = vld [vmem:[#allocation7 + $0xf8] ss:$12 sps:$4 sm:$0xff]  }
  0x5b   :  { %305 = vmatprep.subr.bf16.mxu0 %v1790_v9  ;;  %346 = vmatprep.subr.bf16.mxu1 %v1814_v23  ;;  %v1835_v44 = vld [vmem:[#allocation7 + $0x48] ss:$12 sps:$4 sm:$0xff]   ;;  %v1838_v47 = vld [vmem:[#allocation7 + $0x60] ss:$12 sps:$4 sm:$0xff]   ;;  %v1841_v51 = vld [vmem:[#allocation7 + $0x78] ss:$12 sps:$4 sm:$0xff]  }
  0x5c   :  { %v1859_v48 = vld [vmem:[#allocation7 + $0x20] ss:$12 sps:$4 sm:$0xff]   ;;  %v1843_v50 = vld [vmem:[#allocation7 + $0x7c] ss:$12 sps:$4 sm:$0xff]   ;;  %v1864_v52 = vld [vmem:[#allocation7 + $0x38] ss:$12 sps:$4 sm:$0xff]  }
  0x5d   :  { %v1868_v53 = vld [vmem:[#allocation7 + $0x110] ss:$12 sps:$4 sm:$0xff]   ;;  %v1873_v57 = vld [vmem:[#allocation7 + $0x128] ss:$12 sps:$4 sm:$0xff]   ;;  %v1849_v58 = vld [vmem:[#allocation7 + $0xac] ss:$12 sps:$4 sm:$0xff]  }
  0x5e   :  { %306 = vmatpush1.bf16.msra.mxu0 %v1792_v13  ;;  %347 = vmatpush1.bf16.msra.mxu1 %v1816_v27  ;;  %v1869_v55 = vld [vmem:[#allocation7 + $0x50] ss:$12 sps:$4 sm:$0xff]   ;;  %v1874_v59 = vld [vmem:[#allocation7 + $0x68] ss:$12 sps:$4 sm:$0xff]   ;;  %v1878_v61 = vld [vmem:[#allocation7 + $0x140] ss:$12 sps:$4 sm:$0xff]  }
  0x5f   :  { %307 = vmatprep.subr.bf16.mxu0 %v1793_v16  ;;  %348 = vmatprep.subr.bf16.mxu1 %v1817_v28  ;;  %v1844_v56 = vld [vmem:[#allocation7 + $0x90] ss:$12 sps:$4 sm:$0xff]   ;;  %v1847_v60 = vld [vmem:[#allocation7 + $0xa8] ss:$12 sps:$4 sm:$0xff]   ;;  %v1879_v63 = vld [vmem:[#allocation7 + $0x80] ss:$12 sps:$4 sm:$0xff]  }
  0x60   :  { %v1852_v62 = vld [vmem:[#allocation7 + $0xc4] ss:$12 sps:$4 sm:$0xff]   ;;  %v1850_v0 = vld [vmem:[#allocation7 + $0xc0] ss:$12 sps:$4 sm:$0xff]   ;;  %v1857_v1 = vld [vmem:[#allocation7 + $0xdc] ss:$12 sps:$4 sm:$0xff]  }
  0x61   :  { %v1855_v2 = vld [vmem:[#allocation7 + $0xd8] ss:$12 sps:$4 sm:$0xff]   ;;  %v1862_v3 = vld [vmem:[#allocation7 + $0xf4] ss:$12 sps:$4 sm:$0xff]   ;;  %v1860_v4 = vld [vmem:[#allocation7 + $0xf0] ss:$12 sps:$4 sm:$0xff]  }
  0x62   :  { %308 = vmatpush1.bf16.msra.mxu0 %v1795_v17  ;;  %349 = vmatpush1.bf16.msra.mxu1 %v1819_v31  ;;  %v1867_v5 = vld [vmem:[#allocation7 + $0x10c] ss:$12 sps:$4 sm:$0xff]   ;;  %v1865_v6 = vld [vmem:[#allocation7 + $0x108] ss:$12 sps:$4 sm:$0xff]   ;;  %v1872_v7 = vld [vmem:[#allocation7 + $0x124] ss:$12 sps:$4 sm:$0xff]  }
  0x63   :  { %309 = vmatprep.subr.bf16.mxu0 %v1796_v20  ;;  %350 = vmatprep.subr.bf16.mxu1 %v1820_v32  ;;  %v1870_v8 = vld [vmem:[#allocation7 + $0x120] ss:$12 sps:$4 sm:$0xff]   ;;  %v1877_v9 = vld [vmem:[#allocation7 + $0x13c] ss:$12 sps:$4 sm:$0xff]   ;;  %v1875_v10 = vld [vmem:[#allocation7 + $0x138] ss:$12 sps:$4 sm:$0xff]  }
  0x64   :  { %v1882_v11 = vld [vmem:[#allocation7 + $0x154] ss:$12 sps:$4 sm:$0xff]   ;;  %v1883_v12 = vld [vmem:[#allocation7 + $0x158] ss:$12 sps:$4 sm:$0xff]   ;;  %v1880_v13 = vld [vmem:[#allocation7 + $0x150] ss:$12 sps:$4 sm:$0xff]  }
  0x65   :  { %v1884_v14 = vld [vmem:[#allocation7 + $0x98] ss:$12 sps:$4 sm:$0xff]   ;;  %v1888_v16 = vld [vmem:[#allocation7 + $0x170] ss:$12 sps:$4 sm:$0xff]   ;;  %v1885_v17 = vld [vmem:[#allocation7 + $0x168] ss:$12 sps:$4 sm:$0xff]  }
  0x66   :  { %310 = vmatpush1.bf16.msra.mxu0 %v1798_v21  ;;  %351 = vmatpush1.bf16.msra.mxu1 %v1822_v35  ;;  %v1887_v15 = vld [vmem:[#allocation7 + $0x16c] ss:$12 sps:$4 sm:$0xff]   ;;  %v1889_v18 = vld [vmem:[#allocation7 + $0xb0] ss:$12 sps:$4 sm:$0xff]   ;;  %v1893_v20 = vld [vmem:[#allocation7 + $0x248] ss:$12 sps:$4 sm:$0xff]   ;;  %v117_v21 = vlaneseq }
  0x67   :  { %311 = vmatprep.subr.bf16.mxu0 %v1799_v24  ;;  %352 = vmatprep.subr.bf16.mxu1 %v1823_v36  ;;  %v1892_v19 = vld [vmem:[#allocation7 + $0x184] ss:$12 sps:$4 sm:$0xff]   ;;  %s2111_s8 = smov [#allocation10]  }
  0x68   :  { %v2200_v22 = vshrl.u32 %v117_v21, 7  ;;  %v2206_v24 = vld [vmem:[%s2247_s2] sm:$0xf]  ;;  %v1933_v21 = vld [vmem:[#allocation7 + $0x258] ss:$12 sps:$4 sm:$0xff]   ;;  %s1499_s9 = sshll.u32 %s2111_s8, 4  ;;  %s1500_s9 = int_to_ptr.vmem [resolvable:$true] %s1499_s9 }
  0x69   :  { %s2068_s10 = scalar_lea.vmem %s1500_s9, 32  ;;  %p2073_p5 = scmp.lt.s32.totalorder %s1500_s9, %s1500_s9 }
  0x6a   :  { %312 = vmatpush1.bf16.msra.mxu0 %v1801_v25  ;;  %353 = vmatpush1.bf16.msra.mxu1 %v1825_v39  ;;  %v119_v23 = vsub.s32 0, %v2200_v22  ;;  %v123_v25 = vsub.s32 1, %v2200_v22  ;;  %v131_v36 = vsub.s32 3, %v2200_v22  ;;  %v1894_v39 = vld [vmem:[#allocation7 + $0x188] ss:$12 sps:$4 sm:$0xff]   ;;  %p2069_p4 = scmp.ne.s32.totalorder %s1500_s9, %s2068_s10  ;;  %p2074_p6 = scmp.lt.s32.totalorder %s2068_s10, %s2068_s10 }
  0x6b   :  { %1044 = vmatprep.subr.bf16.mxu0 %v1828_v29  ;;  %1663 = vmatprep.subr.bf16.mxu1 %v1853_v41  ;;  %v1897_v41 = vld [vmem:[#allocation7 + $0x19c] ss:$12 sps:$4 sm:$0xff]  }
  0x6c   :  { %v120_v26 = vrot.slane %v2206_v24, %v119_v23  ;;  %v124_v27 = vrot.slane %v2206_v24, %v123_v25  ;;  %p2075_p7 = por %p2074_p6, %p2073_p5 }
  0x6d   :  { %330 = vmatmul.mubr.bf16.vlgmr.msra.gmra.mrb[0].mxu0 %v82_v30  ;;  %371 = vmatmul.mubr.bf16.vlgmr.msra.gmra.mrb[0].mxu1 %v82_v30 }
  0x6e   :  { %1045 = vmatpush1.bf16.msra.mxu0 %v1826_v33  ;;  %1664 = vmatpush3.bf16.msra.mxu1 %v1854_v43  ;;  %v132_v43 = vrot.slane %v2206_v24, %v131_v36  ;;  %v1951_v36 = vld [vmem:[#allocation7 + $0x2e8] ss:$12 sps:$4 sm:$0xff]   ;;  %p2076_p8 = pnand %p2075_p7, %p2069_p4 }
  0x6f   :  { %1046 = vmatprep.subr.bf16.mxu0 %v1831_v34  ;;  %1665 = vmatprep.subr.bf16.mxu1 %v1858_v45  ;;  %v1899_v45 = vld [vmem:[#allocation7 + $0x1a0] ss:$12 sps:$4 sm:$0xff]  }
  0x72   :  { %1047 = vmatpush1.bf16.msra.mxu0 %v1829_v37  ;;  %1666 = vmatpush3.bf16.msra.mxu1 %v1859_v48 }
  0x73   :  { %1048 = vmatprep.subr.bf16.mxu0 %v1834_v38  ;;  %1667 = vmatprep.subr.bf16.mxu1 %v1863_v49  ;;  %v1890_v38 = vld [vmem:[#allocation7 + $0x180] ss:$12 sps:$4 sm:$0xff]  }
  0x76   :  { %1049 = vmatpush1.bf16.msra.mxu0 %v1832_v40  ;;  %1668 = vmatpush3.bf16.msra.mxu1 %v1864_v52  ;;  %v1900_v52 = vld [vmem:[#allocation7 + $0x1b0] ss:$12 sps:$4 sm:$0xff]  }
  0x77   :  { %1050 = vmatprep.subr.bf16.mxu0 %v1837_v42  ;;  %1669 = vmatprep.subr.bf16.mxu1 %v1868_v53  ;;  %v1898_v42 = vld [vmem:[#allocation7 + $0x260] ss:$12 sps:$4 sm:$0xff]   ;;  %v1904_v53 = vld [vmem:[#allocation7 + $0x1b8] ss:$12 sps:$4 sm:$0xff]  }
  0x7a   :  { %1051 = vmatpush1.bf16.msra.mxu0 %v1835_v44  ;;  %1670 = vmatpush3.bf16.msra.mxu1 %v1869_v55  ;;  %v1895_v44 = vld [vmem:[#allocation7 + $0x198] ss:$12 sps:$4 sm:$0xff]  }
  0x7b   :  { %1052 = vmatprep.subr.bf16.mxu0 %v1840_v46  ;;  %1671 = vmatprep.subr.bf16.mxu1 %v1873_v57  ;;  %v1902_v46 = vld [vmem:[#allocation7 + $0x1b4] ss:$12 sps:$4 sm:$0xff]   ;;  %v1907_v55 = vld [vmem:[#allocation7 + $0x1cc] ss:$12 sps:$4 sm:$0xff]  }
  0x7e   :  { %1053 = vmatpush1.bf16.msra.mxu0 %v1838_v47  ;;  %1672 = vmatpush3.bf16.msra.mxu1 %v1874_v59  ;;  %v1903_v47 = vld [vmem:[#allocation7 + $0x278] ss:$12 sps:$4 sm:$0xff]   ;;  %v1905_v59 = vld [vmem:[#allocation7 + $0x1c8] ss:$12 sps:$4 sm:$0xff]  }
  0x7f   :  { %1054 = vmatprep.subr.bf16.mxu0 %v1843_v50  ;;  %1673 = vmatprep.subr.bf16.mxu1 %v1878_v61  ;;  %v1912_v61 = vld [vmem:[#allocation7 + $0x1e4] ss:$12 sps:$4 sm:$0xff]  }
  0x82   :  { %1055 = vmatpush1.bf16.msra.mxu0 %v1841_v51  ;;  %1674 = vmatpush3.bf16.msra.mxu1 %v1879_v63  ;;  %v127_v63 = vsub.s32 2, %v2200_v22  ;;  %v1972_v22 = vld [vmem:[#allocation8 + $0x90] sm:$0xff]  }
  0x83   :  { %1056 = vmatprep.subr.bf16.mxu0 %v1846_v54  ;;  %1675 = vmatprep.subr.bf16.mxu1 %v1883_v12  ;;  %v1927_v12 = vld [vmem:[#allocation7 + $0x22c] ss:$12 sps:$4 sm:$0xff]  }
  0x86   :  { %1057 = vmatpush1.bf16.msra.mxu0 %v1844_v56  ;;  %1676 = vmatpush3.bf16.msra.mxu1 %v1884_v14  ;;  %v1908_v56 = vld [vmem:[#allocation7 + $0x290] ss:$12 sps:$4 sm:$0xff]  }
  0x87   :  { %1058 = vmatprep.subr.bf16.mxu0 %v1849_v58  ;;  %1677 = vmatprep.subr.bf16.mxu1 %v1888_v16  ;;  %v1929_v16 = vld [vmem:[#allocation7 + $0x230] ss:$12 sps:$4 sm:$0xff]  }
  0x8a   :  { %1059 = vmatpush1.bf16.msra.mxu0 %v1847_v60  ;;  %1678 = vmatpush3.bf16.msra.mxu1 %v1889_v18  ;;  %v1909_v60 = vld [vmem:[#allocation7 + $0x1d0] ss:$12 sps:$4 sm:$0xff]  }
  0x8b   :  { %1060 = vmatprep.subr.bf16.mxu0 %v1852_v62  ;;  %1685 = vmatprep.subr.bf16.mxu1 %v1893_v20  ;;  %v1913_v62 = vld [vmem:[#allocation7 + $0x2a8] ss:$12 sps:$4 sm:$0xff]  }
  0x8c   :  { %v1935_v20 = vld [vmem:[#allocation7 + $0x25c] ss:$12 sps:$4 sm:$0xff]  }
  0x8e   :  { %1061 = vmatpush1.bf16.msra.mxu0 %v1850_v0  ;;  %v1910_v0 = vld [vmem:[#allocation7 + $0x1e0] ss:$12 sps:$4 sm:$0xff]  }
  0x8f   :  { %1062 = vmatprep.subr.bf16.mxu0 %v1857_v1  ;;  %v1914_v1 = vld [vmem:[#allocation7 + $0x1e8] ss:$12 sps:$4 sm:$0xff]  }
  0x92   :  { %1063 = vmatpush1.bf16.msra.mxu0 %v1855_v2  ;;  %v1917_v2 = vld [vmem:[#allocation7 + $0x1fc] ss:$12 sps:$4 sm:$0xff]  }
  0x93   :  { %1064 = vmatprep.subr.bf16.mxu0 %v1862_v3  ;;  %v1918_v3 = vld [vmem:[#allocation7 + $0x2c0] ss:$12 sps:$4 sm:$0xff]  }
  0x96   :  { %1065 = vmatpush1.bf16.msra.mxu0 %v1860_v4  ;;  %v128_v4 = vrot.slane %v2206_v24, %v127_v63  ;;  %v1938_v24 = vld [vmem:[#allocation7 + $0x274] ss:$12 sps:$4 sm:$0xff]  }
  0x97   :  { %1066 = vmatprep.subr.bf16.mxu0 %v1867_v5  ;;  %v1915_v5 = vld [vmem:[#allocation7 + $0x1f8] ss:$12 sps:$4 sm:$0xff]  }
  0x9a   :  { %1067 = vmatpush1.bf16.msra.mxu0 %v1865_v6  ;;  %v1919_v6 = vld [vmem:[#allocation7 + $0x200] ss:$12 sps:$4 sm:$0xff]  }
  0x9b   :  { %1068 = vmatprep.subr.bf16.mxu0 %v1872_v7  ;;  %v1922_v7 = vld [vmem:[#allocation7 + $0x214] ss:$12 sps:$4 sm:$0xff]  }
  0x9e   :  { %1069 = vmatpush1.bf16.msra.mxu0 %v1870_v8  ;;  %v1923_v8 = vld [vmem:[#allocation7 + $0x2d8] ss:$12 sps:$4 sm:$0xff]  }
  0x9f   :  { %1070 = vmatprep.subr.bf16.mxu0 %v1877_v9 }
  0xa2   :  { %1071 = vmatpush1.bf16.msra.mxu0 %v1875_v10  ;;  %v1920_v10 = vld [vmem:[#allocation7 + $0x210] ss:$12 sps:$4 sm:$0xff]  }
  0xa3   :  { %1072 = vmatprep.subr.bf16.mxu0 %v1882_v11  ;;  %v1924_v11 = vld [vmem:[#allocation7 + $0x218] ss:$12 sps:$4 sm:$0xff]  }
  0xa6   :  { %1073 = vmatpush1.bf16.msra.mxu0 %v1880_v13  ;;  %v1928_v13 = vld [vmem:[#allocation7 + $0x2f0] ss:$12 sps:$4 sm:$0xff]  }
  0xa7   :  { %1074 = vmatprep.subr.bf16.mxu0 %v1887_v15  ;;  %v1925_v15 = vld [vmem:[#allocation7 + $0x228] ss:$12 sps:$4 sm:$0xff]  }
  0xaa   :  { %1075 = vmatpush1.bf16.msra.mxu0 %v1885_v17  ;;  %v1932_v17 = vld [vmem:[#allocation7 + $0x244] ss:$12 sps:$4 sm:$0xff]  }
  0xab   :  { %1085 = vmatprep.subr.bf16.mxu0 %v1892_v19  ;;  %v1930_v19 = vld [vmem:[#allocation7 + $0x240] ss:$12 sps:$4 sm:$0xff]  }
 0x140   :  { %v331_v28 = vpop.f32.mrb[0].mxu0  ;;  %v372_v48 = vpop.f32.mrb[0].mxu1 }
 0x141   :  { %v332_v29 = vadd.f32 %v331_v28, %v120_v26  ;;  %v333_v30 = vpop.f32.mrb[1].mxu0  ;;  %v374_v49 = vpop.f32.mrb[1].mxu1  ;;  %v373_v9 = vadd.f32 %v372_v48, %v128_v4  ;;  %v1936_v26 = vld [vmem:[#allocation7 + $0x270] ss:$12 sps:$4 sm:$0xff]   ;;  %v1939_v28 = vld [vmem:[#allocation7 + $0x288] ss:$12 sps:$4 sm:$0xff]  }
 0x142   :  { %v334_v31 = vadd.f32 %v333_v30, %v124_v27  ;;  %v335_v32 = vpop.f32.mrb[2].mxu0  ;;  %v375_v50 = vadd.f32 %v374_v49, %v132_v43  ;;  %v376_v51 = vpop.f32.mrb[2].mxu1  ;;  %v1941_v27 = vld [vmem:[#allocation7 + $0x28c] ss:$12 sps:$4 sm:$0xff]   ;;  %v1966_v49 = vld [vmem:[#allocation8 + $0x70] sm:$0xff]  }
 0x143   :  { %v379_v33 = vmax.f32 %v332_v29, 0.0  ;;  %v336_v34 = vpop.f32.mrb[3].mxu0  ;;  %v377_v54 = vpop.f32.mrb[3].mxu1  ;;  %v381_v14 = vmax.f32 %v373_v9, 0.0  ;;  %v1944_v29 = vld [vmem:[#allocation7 + $0x2a4] ss:$12 sps:$4 sm:$0xff]  }
 0x144   :  { %v380_v35 = vmax.f32 %v334_v31, 0.0  ;;  %v382_v57 = vmax.f32 %v375_v50, 0.0  ;;  %v1942_v30 = vld [vmem:[#allocation7 + $0x2a0] ss:$12 sps:$4 sm:$0xff]   ;;  %v1947_v31 = vld [vmem:[#allocation7 + $0x2bc] ss:$12 sps:$4 sm:$0xff]  }
 0x145   :  { %v383_v40 = vpack.c.bf16 %v379_v33, %v379_v33  ;;  %v385_v18 = vpack.c.bf16 %v381_v14, %v381_v14  ;;  %v1945_v32 = vld [vmem:[#allocation7 + $0x2b8] ss:$12 sps:$4 sm:$0xff]   ;;  %v1950_v33 = vld [vmem:[#allocation7 + $0x2d4] ss:$12 sps:$4 sm:$0xff]   ;;  %v1948_v34 = vld [vmem:[#allocation7 + $0x2d0] ss:$12 sps:$4 sm:$0xff]  }
 0x146   :  { %v384_v37 = vpack.c.bf16 %v380_v35, %v380_v35  ;;  %v386_v58 = vpack.c.bf16 %v382_v57, %v382_v57  ;;  %v1953_v35 = vld [vmem:[#allocation7 + $0x2ec] ss:$12 sps:$4 sm:$0xff]   ;;  %v1967_v50 = vld [vmem:[#allocation8 + $0x30] sm:$0xff]  }
 0x147   :  { %v1960_v43 = vld [vmem:[#allocation8 + $0x58] sm:$0xff]   ;;  %v1965_v48 = vld [vmem:[#allocation8 + $0x28] sm:$0xff]  }
 0x148   :  { %1076 = vmatprep.mubr.bf16.mxu0 %v384_v37  ;;  %1158 = vmatprep.mubr.bf16.mxu1 %v384_v37  ;;  %v1954_v37 = vld [vmem:[#allocation8 + $0x40] sm:$0xff]   ;;  %v1968_v51 = vld [vmem:[#allocation8 + $0x78] sm:$0xff]  }
 0x149   :  { %1077 = vmatmul.mubr.bf16.vlgmr.msra.gmra.mrb[4].mxu0 %v383_v40  ;;  %1159 = vmatmul.mubr.bf16.vlgmr.msra.gmra.mrb[4].mxu1 %v383_v40  ;;  %v1957_v40 = vld [vmem:[#allocation8 + $0x8] sm:$0xff]  }
 0x14a   :  { %1086 = vmatpush1.bf16.msra.mxu0 %v1890_v38  ;;  %1686 = vmatpush3.bf16.msra.mxu1 %v1894_v39  ;;  %v1955_v38 = vld [vmem:[#allocation8] sm:$0xff]   ;;  %v1956_v39 = vld [vmem:[#allocation8 + $0x48] sm:$0xff]  }
 0x14b   :  { %1087 = vmatprep.subr.bf16.mxu0 %v1897_v41  ;;  %1687 = vmatprep.subr.bf16.mxu1 %v1898_v42  ;;  %v1958_v41 = vld [vmem:[#allocation8 + $0x50] sm:$0xff]  }
 0x14c   :  { %1198 = vmatprep.mubr.bf16.mxu1 %v386_v58  ;;  %1117 = vmatprep.mubr.bf16.mxu0 %v386_v58  ;;  %v1959_v42 = vld [vmem:[#allocation8 + $0x10] sm:$0xff]  }
 0x14e   :  { %1088 = vmatpush1.bf16.msra.mxu0 %v1895_v44  ;;  %1688 = vmatpush3.bf16.msra.mxu1 %v1899_v45  ;;  %v1961_v44 = vld [vmem:[#allocation8 + $0x18] sm:$0xff]   ;;  %v1962_v45 = vld [vmem:[#allocation8 + $0x60] sm:$0xff]  }
 0x14f   :  { %1089 = vmatprep.subr.bf16.mxu0 %v1902_v46  ;;  %1689 = vmatprep.subr.bf16.mxu1 %v1903_v47  ;;  %v1963_v46 = vld [vmem:[#allocation8 + $0x20] sm:$0xff]   ;;  %v1964_v47 = vld [vmem:[#allocation8 + $0x68] sm:$0xff]  }
 0x152   :  { %1090 = vmatpush1.bf16.msra.mxu0 %v1900_v52  ;;  %1690 = vmatpush3.bf16.msra.mxu1 %v1904_v53  ;;  %v1969_v52 = vld [vmem:[#allocation8 + $0x38] sm:$0xff]   ;;  %v2109_v53 = vmov 0.0  }
 0x153   :  { %1091 = vmatprep.subr.bf16.mxu0 %v1907_v55  ;;  %1691 = vmatprep.subr.bf16.mxu1 %v1908_v56 }
 0x156   :  { %1092 = vmatpush1.bf16.msra.mxu0 %v1905_v59  ;;  %1692 = vmatpush3.bf16.msra.mxu1 %v1909_v60  ;;  %v515_v59 = vld [vmem:[%s2249_s4] sm:$0x7] }
 0x157   :  { %1093 = vmatprep.subr.bf16.mxu0 %v1912_v61  ;;  %1693 = vmatprep.subr.bf16.mxu1 %v1913_v62  ;;  %v528_v60 = vrot.slane %v515_v59, %v127_v63 }
 0x15a   :  { %1094 = vmatpush1.bf16.msra.mxu0 %v1910_v0  ;;  %1694 = vmatpush3.bf16.msra.mxu1 %v1914_v1 }
 0x15b   :  { %1095 = vmatprep.subr.bf16.mxu0 %v1917_v2  ;;  %1695 = vmatprep.subr.bf16.mxu1 %v1918_v3 }
 0x15e   :  { %1096 = vmatpush1.bf16.msra.mxu0 %v1915_v5  ;;  %1696 = vmatpush3.bf16.msra.mxu1 %v1919_v6  ;;  %v520_v5 = vrot.slane %v515_v59, %v119_v23  ;;  %v524_v6 = vrot.slane %v515_v59, %v123_v25  ;;  %v1973_v23 = vld [vmem:[#allocation8 + $0x98] sm:$0xff]   ;;  %v1974_v25 = vld [vmem:[#allocation8 + $0xa0] sm:$0xff]  }
 0x15f   :  { %1097 = vmatprep.subr.bf16.mxu0 %v1922_v7  ;;  %1697 = vmatprep.subr.bf16.mxu1 %v1923_v8 }
 0x162   :  { %1098 = vmatpush1.bf16.msra.mxu0 %v1920_v10  ;;  %1698 = vmatpush3.bf16.msra.mxu1 %v1924_v11 }
 0x163   :  { %1099 = vmatprep.subr.bf16.mxu0 %v1927_v12  ;;  %1699 = vmatprep.subr.bf16.mxu1 %v1928_v13 }
 0x166   :  { %1100 = vmatpush1.bf16.msra.mxu0 %v1925_v15  ;;  %1700 = vmatpush3.bf16.msra.mxu1 %v1929_v16  ;;  %v1970_v15 = vld [vmem:[#allocation8 + $0x80] sm:$0xff]  }
 0x167   :  { %1101 = vmatprep.subr.bf16.mxu0 %v1932_v17  ;;  %1707 = vmatprep.subr.bf16.mxu1 %v1954_v37  ;;  %v1971_v17 = vld [vmem:[#allocation8 + $0x88] sm:$0xff]  }
 0x169   :  { %1199 = vmatmul.mubr.bf16.vlgmr.msra.gmra.mrb[8].mxu1 %v385_v18 }
 0x16a   :  { %1102 = vmatpush1.bf16.msra.mxu0 %v1930_v19  ;;  %1708 = vmatpush3.bf16.msra.mxu1 %v1955_v38  ;;  %v1976_v19 = vld [vmem:[#allocation8 + $0xb0] sm:$0xff]  }
 0x16b   :  { %1103 = vmatprep.subr.bf16.mxu0 %v1935_v20  ;;  %1709 = vmatprep.subr.bf16.mxu1 %v1956_v39  ;;  %v1977_v20 = vld [vmem:[#allocation8 + $0xb8] sm:$0xff]  }
 0x16e   :  { %1104 = vmatpush1.bf16.msra.mxu0 %v1933_v21  ;;  %1710 = vmatpush3.bf16.msra.mxu1 %v1957_v40 }
 0x16f   :  { %1105 = vmatprep.subr.bf16.mxu0 %v1938_v24  ;;  %1711 = vmatprep.subr.bf16.mxu1 %v1958_v41 }
 0x172   :  { %1106 = vmatpush1.bf16.msra.mxu0 %v1936_v26  ;;  %1712 = vmatpush3.bf16.msra.mxu1 %v1959_v42 }
 0x173   :  { %1107 = vmatprep.subr.bf16.mxu0 %v1941_v27  ;;  %1713 = vmatprep.subr.bf16.mxu1 %v1960_v43 }
 0x176   :  { %1108 = vmatpush1.bf16.msra.mxu0 %v1939_v28  ;;  %1714 = vmatpush3.bf16.msra.mxu1 %v1961_v44 }
 0x177   :  { %1109 = vmatprep.subr.bf16.mxu0 %v1944_v29  ;;  %1715 = vmatprep.subr.bf16.mxu1 %v1962_v45 }
 0x17a   :  { %1110 = vmatpush1.bf16.msra.mxu0 %v1942_v30  ;;  %1716 = vmatpush3.bf16.msra.mxu1 %v1963_v46 }
 0x17b   :  { %1111 = vmatprep.subr.bf16.mxu0 %v1947_v31  ;;  %1717 = vmatprep.subr.bf16.mxu1 %v1964_v47  ;;  %v1638_v31 = vld [vmem:[%s2251_s6] ss:$0 sm:$0xff] }
 0x17e   :  { %1112 = vmatpush1.bf16.msra.mxu0 %v1945_v32  ;;  %1718 = vmatpush3.bf16.msra.mxu1 %v1965_v48 }
 0x17f   :  { %1113 = vmatprep.subr.bf16.mxu0 %v1950_v33  ;;  %1719 = vmatprep.subr.bf16.mxu1 %v1966_v49 }
 0x182   :  { %1114 = vmatpush1.bf16.msra.mxu0 %v1948_v34  ;;  %1720 = vmatpush3.bf16.msra.mxu1 %v1967_v50 }
 0x183   :  { %1115 = vmatprep.subr.bf16.mxu0 %v1953_v35  ;;  %1721 = vmatprep.subr.bf16.mxu1 %v1968_v51 }
 0x186   :  { %1116 = vmatpush1.bf16.msra.mxu0 %v1951_v36  ;;  %1722 = vmatpush3.bf16.msra.mxu1 %v1969_v52 }
 0x187   :  { %1738 = vmatprep.subr.bf16.mxu1 %v2109_v53 }
 0x189   :  { %1118 = vmatmul.mubr.bf16.vlgmr.msra.gmra.mrb[4].mxu0 %v385_v18  ;;  %v1975_v18 = vld [vmem:[#allocation8 + $0xa8] sm:$0xff]  }
 0x21c   :  { %v1679_v54 = vpop.f32.mrb[4].mxu1 }
 0x21d   :  { %v1680_v55 = vpop.f32.mrb[5].mxu1 }
 0x21e   :  { %v1681_v56 = vadd.f32 %v1680_v55, %v1679_v54  ;;  %v1682_v57 = vpop.f32.mrb[6].mxu1 }
 0x21f   :  { %v1683_v58 = vpop.f32.mrb[7].mxu1 }
 0x220   :  { %v1161_v0 = vadd.f32 %v1681_v56, %v528_v60 }
 0x23c   :  { %v1701_v61 = vpop.f32.mrb[8].mxu1 }
 0x23d   :  { %v1702_v62 = vpop.f32.mrb[9].mxu1 }
 0x23e   :  { %v1703_v1 = vadd.f32 %v1702_v62, %v1701_v61  ;;  %v1704_v2 = vpop.f32.mrb[10].mxu1 }
 0x23f   :  { %v1705_v3 = vpop.f32.mrb[11].mxu1 }
 0x240   :  { %v1201_v4 = vadd.f32 %v1703_v1, %v1161_v0 }
 0x242   :  { %v1208_v21 = vmax.f32 %v1201_v4, 0.0 }
 0x244   :  { %v1211_v24 = vpack.c.bf16 %v1208_v21, %v1208_v21 }
 0x25c   :  { %v1119_v7 = vpop.f32.mrb[4].mxu0 }
 0x25d   :  { %v1758_v8 = vadd.f32 %v1119_v7, %v520_v5  ;;  %v1121_v9 = vpop.f32.mrb[5].mxu0 }
 0x25e   :  { %v1759_v10 = vadd.f32 %v1121_v9, %v524_v6  ;;  %v1123_v11 = vpop.f32.mrb[6].mxu0 }
 0x25f   :  { %v1206_v12 = vmax.f32 %v1758_v8, 0.0  ;;  %v1124_v63 = vpop.f32.mrb[7].mxu0 }
 0x260   :  { %v1207_v13 = vmax.f32 %v1759_v10, 0.0 }
 0x261   :  { %v1209_v16 = vpack.c.bf16 %v1206_v12, %v1206_v12 }
 0x262   :  { %v1210_v14 = vpack.c.bf16 %v1207_v13, %v1207_v13 }
 0x264   :  { %1443 = vmatprep.mubr.bf16.mxu1 %v1210_v14 }
 0x265   :  { %1444 = vmatmul.mubr.bf16.vlgmr.msra.gmra.mrb[12].mxu1 %v1209_v16 }
 0x266   :  { %1739 = vmatpush3.bf16.msra.mxu1 %v1970_v15  ;;  %1754 = vmatprep.mubr.msk.bf16.mxu1 %vm2110_vm0, %v2109_v53 }
 0x267   :  { %1740 = vmatprep.subr.bf16.mxu1 %v2109_v53 }
 0x26a   :  { %1741 = vmatpush3.bf16.msra.mxu1 %v1971_v17 }
 0x26b   :  { %1742 = vmatprep.subr.bf16.mxu1 %v2109_v53 }
 0x26e   :  { %1743 = vmatpush3.bf16.msra.mxu1 %v1972_v22 }
 0x26f   :  { %1744 = vmatprep.subr.bf16.mxu1 %v2109_v53 }
 0x272   :  { %1745 = vmatpush3.bf16.msra.mxu1 %v1973_v23 }
 0x273   :  { %1746 = vmatprep.subr.bf16.mxu1 %v2109_v53 }
 0x276   :  { %1747 = vmatpush3.bf16.msra.mxu1 %v1974_v25 }
 0x277   :  { %1748 = vmatprep.subr.bf16.mxu1 %v2109_v53 }
 0x27a   :  { %1749 = vmatpush3.bf16.msra.mxu1 %v1975_v18 }
 0x27b   :  { %1750 = vmatprep.subr.bf16.mxu1 %v2109_v53 }
 0x27e   :  { %1751 = vmatpush3.bf16.msra.mxu1 %v1976_v19 }
 0x27f   :  { %1752 = vmatprep.subr.bf16.mxu1 %v2109_v53 }
 0x282   :  { %1753 = vmatpush3.bf16.msra.mxu1 %v1977_v20 }
 0x285   :  { %1755 = vmatmul.mubr.bf16.vlgmr.msra.gmra.mrb[16].mxu1 %v1211_v24 }
 0x338   :  { %v1723_v26 = vpop.f32.mrb[12].mxu1 }
 0x339   :  { %v1724_v27 = vpop.f32.mrb[13].mxu1 }
 0x33a   :  { %v1725_v28 = vadd.f32 %v1724_v27, %v1723_v26  ;;  %v1726_v29 = vpop.f32.mrb[14].mxu1 }
 0x33b   :  { %v1727_v30 = vpop.f32.mrb[15].mxu1 }
 0x33c   :  { %v1446_v32 = vadd.f32 %v1725_v28, %v1638_v31 }
 0x358   :  { %v1485_v33 = vpop.f32.mrb[16].mxu1 }
 0x359   :  { %v1486_v34 = vadd.f32 %v1485_v33, %v1446_v32  ;;  %v1756_v35 = vpop.f32.mrb[17].mxu1 }
 0x35a   :  { %v1488_v36 = vpop.f32.mrb[18].mxu1 }
 0x35b   :  { %1978 = vtanh.f32 %v1486_v34  ;;  %v1757_v37 = vpop.f32.mrb[19].mxu1 }
 0x365   :  { %v1979_v38 = vpop.eup %1978 }
 0x366   :  { %1492 = vst [vmem:[#allocation10] sm:$0x3] %v1979_v38 }
 0x367   :  { %2079 = shalt.err (!%p2076_p8)
}
 0x368   :  { %s2080_s12 = scalar_lea.hbm %s2252_s7, 32 }
 0x369   :  { %p2081_p9 = scmp.ne.s32.totalorder %s2252_s7, %s2080_s12  ;;  %p2084_p10 = scmp.lt.u32.totalorder %s2080_s12, %s2252_s7 }
 0x36b   :  { %p2086_p11 = pnand %p2084_p10, %p2081_p9 }
 0x36d   :  { %2089 = shalt.err (!%p2086_p11)
}
 0x36e   :  { %1502 = dma.vmem_to_hbm [thread:$0]  %s1500_s9, 32, %s2252_s7, [#allocation4]  }
 0x36f   :  { %2096 = dma.done.wait [#allocation4], 32  }
 0x370   :  { %2097 = vsyncadd [#allocation4], 4294967264 }
 0x371   :  { %1506 = vsyncpa [#allocation3], 1 }
 0x372   :  { %1507 = vsyncpa [#allocation6], 1 }
 0x373   :  { %1508 = vsyncpa [#allocation9], 1 }
 0x374   :  { %1509 = vsyncpa [#allocation4], 1 }

</bundles_post_ra>
